<compile_context>
chip_gen: v5e
topology: v5e:2x2
jax: 0.10.0
libtpu: 0.0.40
codegen_flags: <defaults>
</compile_context>

<pallas_src>
from functools import partial

import jax
import jax.numpy as jnp
from jax import lax
from jax.experimental import pallas as pl
from jax.experimental.pallas import tpu as pltpu


def _round_up(x, m):
    return (x + m - 1) // m * m


def _vmem_capacity_bytes():
    """Physical VMEM per TensorCore; conservative (v7x-sized) default on failure."""
    try:
        cap = getattr(pltpu.get_tpu_info(), "vmem_capacity_bytes", None)
        if cap:
            return int(cap)
    except Exception:
        pass
    return 64 * 1024 * 1024


def _choose_tk(c_pad, l, itemsize, budget_bytes, tgt_bufs):
    """Largest lane-aligned k tile whose working set fits the VMEM budget.

    Working set per batch element:
      2 * c_pad * tk * itemsize        double-buffered (c_pad, tk) feature slab
      tgt_bufs * c_pad^2 * itemsize    target-Gram buffer(s)
      c_pad^2 * 4                      resident f32 Gram accumulator
    """
    fixed = c_pad * c_pad * 4 + tgt_bufs * c_pad * c_pad * itemsize
    avail = budget_bytes - fixed
    tk = 128
    if avail > 0:
        tk = max(128, (avail // (2 * c_pad * itemsize)) // 128 * 128)
    # TODO(synk): for very large C (>~1.5k channels) `fixed` alone can exceed
    # the budget on v7x; add (ci, cj) output tiling of the Gram matrix instead
    # of only shrinking tk.
    return int(min(tk, _round_up(l, 128)))


def _dimension_semantics(n):
    """Batch-axis semantics: CORE_PARALLEL on v7x (2 TCs/chip) when N >= 2."""
    if n >= 2:
        try:
            kind = jax.devices()[0].device_kind.lower()
        except Exception:
            kind = ""
        if "v7" in kind or "7x" in kind:
            return (pltpu.CORE_PARALLEL, pltpu.ARBITRARY)
    return ("parallel", "arbitrary")


def _style_loss_kernel(mat_ref, tgt_ref, ss_ref, sa_ref, gram_acc, *,
                       inv_l, l_tail, matmul_dtype):
    k = pl.program_id(1)
    nk = pl.num_programs(1)

    # Reset the Gram accumulator at the start of each batch element's k loop.
    @pl.when(k == 0)
    def _():
        gram_acc[...] = jnp.zeros_like(gram_acc)

    m = mat_ref[0]                                   # (c_pad, tk), native dtype
    if matmul_dtype is not None:
        m = m.astype(matmul_dtype)                   # opt-in bf16 operands

    # A @ A^T contracting the lane axis of both operands (no explicit transpose
    # of the tile), accumulated in f32 on the MXU.
    # TODO(synk): confirm with pl.lower_as_mlir that this Mosaic version does
    # not emit a per-step vxpose/staging copy for the lane-lane contraction.
    def gram_update(mm):
        gram_acc[...] += lax.dot_general(
            mm, mm,
            dimension_numbers=(((1,), (1,)), ((), ())),
            preferred_element_type=jnp.float32,
        )

    if l_tail:
        # Ragged L tail: the last k tile extends past L and its out-of-bounds
        # columns hold undefined data -> zero them, but only on the last step
        # (the VPU select is off the hot path for all other steps).
        @pl.when(k < nk - 1)
        def _():
            gram_update(m)

        @pl.when(k == nk - 1)
        def _():
            col = lax.broadcasted_iota(jnp.int32, m.shape, 1)
            gram_update(jnp.where(col < l_tail, m, jnp.zeros_like(m)))
    else:
        gram_update(m)

    # Finalize once per batch element: 1/L scale, diff vs. target Gram,
    # global reductions, lane-dense per-batch partial outputs.
    @pl.when(k == nk - 1)
    def _():
        gram = gram_acc[...] * inv_l
        diff = gram - tgt_ref[0].astype(jnp.float32)
        ss = jnp.sum(diff * diff)
        sa = jnp.sum(jnp.abs(diff))
        ss_ref[...] = jnp.zeros_like(ss_ref) + ss
        sa_ref[...] = jnp.zeros_like(sa_ref) + sa


def style_loss(x, target_gram, eps=1e-8, *, matmul_in_bf16=False):
    """x: (N, C, H, W) features; target_gram: (N, C, C). Returns scalar loss.

    Matches StyleLoss.forward: G = mat @ mat^T / L per batch element, then
    ScaledMSELoss: sum(diff^2) / (sum(|diff|) + eps) over all elements.
    `matmul_in_bf16=True` feeds bf16 operands to the MXU (f32 accumulation);
    opt-in because it slightly changes numerics.
    """
    N, C, H, W = x.shape
    L = H * W
    mat = x.reshape(N, C, L)
    itemsize = jnp.dtype(x.dtype).itemsize

    # Sublane packing of the dtype: 8 for f32, 16 for bf16, 32 for int8/fp8.
    sub = max(8, 32 // itemsize)
    c_pad = _round_up(max(C, sub), sub)

    # C is padded only when it is not sublane-aligned (rare: real feature maps
    # have C % 8 == 0). The huge L axis is NEVER padded -- the ragged tail is
    # masked inside the kernel, saving a full extra HBM pass over the input.
    # Zero-padding of C is exact: padded rows contribute 0 to the Gram and the
    # padded target entries are 0, so diff there is 0.
    tgt = target_gram
    if c_pad != C:
        mat = jnp.pad(mat, ((0, 0), (0, c_pad - C), (0, 0)))
        tgt = jnp.pad(tgt, ((0, 0), (0, c_pad - C), (0, c_pad - C)))

    phys = _vmem_capacity_bytes()
    budget = (48 << 20) if phys >= (96 << 20) else (24 << 20)  # v5e/v6e vs v7x
    single_buffer_tgt = c_pad >= 256    # target only read at the last k step
    tgt_bufs = 1 if single_buffer_tgt else 2
    tk = _choose_tk(c_pad, L, itemsize, budget, tgt_bufs)
    kt = pl.cdiv(L, tk)
    l_tail = L % tk

    matmul_dtype = None
    if matmul_in_bf16 and jnp.dtype(x.dtype) == jnp.dtype(jnp.float32):
        matmul_dtype = jnp.bfloat16

    tgt_itemsize = jnp.dtype(tgt.dtype).itemsize
    working = (2 * c_pad * tk * itemsize
               + tgt_bufs * c_pad * c_pad * tgt_itemsize
               + c_pad * c_pad * 4
               + 4 * 8 * 128 * 4)
    vmem_limit = int(min(max(working + (4 << 20), 32 << 20), phys - (4 << 20)))

    kernel = partial(_style_loss_kernel, inv_l=1.0 / L, l_tail=l_tail,
                     matmul_dtype=matmul_dtype)

    if single_buffer_tgt:
        tgt_spec = pl.BlockSpec((1, c_pad, c_pad), lambda b, k: (b, 0, 0),
                                pipeline_mode=pl.Buffered(1))
    else:
        tgt_spec = pl.BlockSpec((1, c_pad, c_pad), lambda b, k: (b, 0, 0))

    def _call(dim_sem):
        return pl.pallas_call(
            kernel,
            out_shape=(
                jax.ShapeDtypeStruct((N, 8, 128), jnp.float32),
                jax.ShapeDtypeStruct((N, 8, 128), jnp.float32),
            ),
            grid_spec=pltpu.PrefetchScalarGridSpec(
                num_scalar_prefetch=0,
                grid=(N, kt),                      # reduction axis (k) last
                in_specs=[
                    # K-tiled flattened feature map: a (c_pad, tk) slab per step.
                    pl.BlockSpec((1, c_pad, tk), lambda b, k: (b, 0, k)),
                    # Target Gram: resident across the k loop of a batch element.
                    tgt_spec,
                ],
                out_specs=[
                    pl.BlockSpec((1, 8, 128), lambda b, k: (b, 0, 0)),
                    pl.BlockSpec((1, 8, 128), lambda b, k: (b, 0, 0)),
                ],
                scratch_shapes=[
                    pltpu.VMEM((c_pad, c_pad), jnp.float32),  # Gram accumulator
                ],
            ),
            compiler_params=pltpu.CompilerParams(
                dimension_semantics=dim_sem,
                vmem_limit_bytes=vmem_limit,
            ),
        )(mat, tgt)

    dim_sem = _dimension_semantics(N)
    try:
        ss, sa = _call(dim_sem)
    except Exception:
        if dim_sem == ("parallel", "arbitrary"):
            raise
        ss, sa = _call(("parallel", "arbitrary"))   # safe fallback

    # Tiny final reduction + eps-divide in plain JAX.
    ss_total = jnp.sum(ss[:, 0, 0])
    sa_total = jnp.sum(sa[:, 0, 0])
    return ss_total / (sa_total + eps)


def get_target_ref(feats):
    """Plain-JAX equivalent of StyleLoss.get_target (glue, not the hot path)."""
    N, C, H, W = feats.shape
    mat = feats.reshape(N, C, H * W)
    return jnp.einsum("ncl,ndl->ncd", mat, mat) / (H * W)


def style_loss_ref(x, target_gram, eps=1e-8):
    g = get_target_ref(x)
    diff = g - target_gram
    return jnp.sum(diff ** 2) / (jnp.sum(jnp.abs(diff)) + eps)


if __name__ == "__main__":
    key = jax.random.PRNGKey(0)
    k_x, k_t, k_x2, k_t2 = jax.random.split(key, 4)

    # Primary shape implied by the module.
    N, C, H, W = 2, 4, 16, 16
    x = jax.random.normal(k_x, (N, C, H, W), dtype=jnp.float32)
    target_feats = jax.random.normal(k_t, (N, C, H, W), dtype=jnp.float32)
    target_gram = get_target_ref(target_feats)

    loss = jax.block_until_ready(style_loss(x, target_gram))
    ref = style_loss_ref(x, target_gram)
    assert jnp.allclose(loss, ref, rtol=1e-5, atol=1e-5), (loss, ref)

    # Ragged spatial size + non-aligned C: exercises the in-kernel tail masking.
    N2, C2, H2, W2 = 2, 5, 13, 11
    x2 = jax.random.normal(k_x2, (N2, C2, H2, W2), dtype=jnp.float32)
    tgt_feats2 = jax.random.normal(k_t2, (N2, C2, H2, W2), dtype=jnp.float32)
    target_gram2 = get_target_ref(tgt_feats2)

    loss2 = jax.block_until_ready(style_loss(x2, target_gram2))
    ref2 = style_loss_ref(x2, target_gram2)
    assert jnp.allclose(loss2, ref2, rtol=1e-5, atol=1e-5), (loss2, ref2)

    print("KERNEL_OK")
</pallas_src>

<mosaic_0001>
module attributes {stable_mosaic.version = 11 : i64} {
  func.func @_style_loss_kernel(%arg0: i32, %arg1: i32, %arg2: memref<1x8x256xf32, #tpu.memory_space<vmem>>, %arg3: memref<1x8x8xf32, #tpu.memory_space<vmem>>, %arg4: memref<1x8x128xf32, #tpu.memory_space<vmem>>, %arg5: memref<1x8x128xf32, #tpu.memory_space<vmem>>, %arg6: memref<8x8xf32, #tpu.memory_space<vmem>>) attributes {dimension_semantics = [#tpu.dimension_semantics<parallel>, #tpu.dimension_semantics<arbitrary>], iteration_bounds = array<i64: 2, 1>, scalar_prefetch = 0 : i64, scratch_operands = 1 : i64, tpu.core_type = #tpu.core_type<tc>, window_params = [{transform_indices = @transform_0, window_bounds = array<i64: 1, 8, 256>}, {transform_indices = @transform_1, window_bounds = array<i64: 1, 8, 8>}, {transform_indices = @transform_2, window_bounds = array<i64: 1, 8, 128>}, {transform_indices = @transform_3, window_bounds = array<i64: 1, 8, 128>}]} {
    %c0_i32 = arith.constant 0 : i32
    %0 = arith.cmpi eq, %arg1, %c0_i32 : i32
    %1 = arith.extui %0 : i1 to i32
    %c0_i32_0 = arith.constant 0 : i32
    %2 = arith.cmpi ne, %1, %c0_i32_0 : i32
    scf.if %2 {
      %cst_9 = arith.constant 0.000000e+00 : f32
      %12 = vector.broadcast %cst_9 : f32 to vector<8x8xf32>
      %c0_10 = arith.constant 0 : index
      %c0_11 = arith.constant 0 : index
      %13 = vector.load %arg6[%c0_10, %c0_11] : memref<8x8xf32, #tpu.memory_space<vmem>>, vector<8x8xf32>
      tpu.vector_store %arg6[%c0_10, %c0_11], %12 {strides = array<i32>} : memref<8x8xf32, #tpu.memory_space<vmem>>, vector<8x8xf32>,
    } else {
    }
    %c0 = arith.constant 0 : index
    %c0_1 = arith.constant 0 : index
    %c0_2 = arith.constant 0 : index
    %3 = vector.load %arg2[%c0, %c0_1, %c0_2] : memref<1x8x256xf32, #tpu.memory_space<vmem>>, vector<1x8x256xf32>
    %4 = vector.shape_cast %3 : vector<1x8x256xf32> to vector<8x256xf32>
    %c0_3 = arith.constant 0 : index
    %c0_4 = arith.constant 0 : index
    %5 = vector.load %arg6[%c0_3, %c0_4] : memref<8x8xf32, #tpu.memory_space<vmem>>, vector<8x8xf32>
    %cst = arith.constant dense<0.000000e+00> : vector<8x8xf32>
    %6 = tpu.matmul %4, %4, %cst {dimension_numbers = #tpu.dot_dimension_numbers<[1], [1], [0], [0], [0, 0, 1, 0], [], []>} : vector<8x256xf32>, vector<8x256xf32>, vector<8x8xf32> -> vector<8x8xf32>
    %7 = arith.addf %5, %6 : vector<8x8xf32>
    %c0_5 = arith.constant 0 : index
    %c0_6 = arith.constant 0 : index
    %8 = vector.load %arg6[%c0_5, %c0_6] : memref<8x8xf32, #tpu.memory_space<vmem>>, vector<8x8xf32>
    tpu.vector_store %arg6[%c0_5, %c0_6], %7 {strides = array<i32>} : memref<8x8xf32, #tpu.memory_space<vmem>>, vector<8x8xf32>,
    %c0_i32_7 = arith.constant 0 : i32
    %9 = arith.cmpi eq, %arg1, %c0_i32_7 : i32
    %10 = arith.extui %9 : i1 to i32
    %c0_i32_8 = arith.constant 0 : i32
    %11 = arith.cmpi ne, %10, %c0_i32_8 : i32
    scf.if %11 {
      %c0_9 = arith.constant 0 : index
      %c0_10 = arith.constant 0 : index
      %12 = vector.load %arg6[%c0_9, %c0_10] : memref<8x8xf32, #tpu.memory_space<vmem>>, vector<8x8xf32>
      %cst_11 = arith.constant 3.906250e-03 : f32
      %13 = vector.broadcast %cst_11 : f32 to vector<8x8xf32>
      %14 = arith.mulf %12, %13 : vector<8x8xf32>
      %c0_12 = arith.constant 0 : index
      %c0_13 = arith.constant 0 : index
      %c0_14 = arith.constant 0 : index
      %15 = vector.load %arg3[%c0_12, %c0_13, %c0_14] : memref<1x8x8xf32, #tpu.memory_space<vmem>>, vector<1x8x8xf32>
      %16 = vector.shape_cast %15 : vector<1x8x8xf32> to vector<8x8xf32>
      %17 = arith.subf %14, %16 : vector<8x8xf32>
      %18 = arith.mulf %17, %17 : vector<8x8xf32>
      %19 = vector.shape_cast %18 : vector<8x8xf32> to vector<1x8x8xf32>
      %cst_15 = arith.constant dense<0.000000e+00> : vector<1xf32>
      %20 = vector.multi_reduction <add>, %19, %cst_15 [1, 2] : vector<1x8x8xf32> to vector<1xf32>
      %21 = vector.shape_cast %20 : vector<1xf32> to vector<1x1x1xf32>
      %22 = vector.extract %21[0, 0, 0] : f32 from vector<1x1x1xf32>
      %23 = math.absf %17 : vector<8x8xf32>
      %24 = vector.shape_cast %23 : vector<8x8xf32> to vector<1x8x8xf32>
      %cst_16 = arith.constant dense<0.000000e+00> : vector<1xf32>
      %25 = vector.multi_reduction <add>, %24, %cst_16 [1, 2] : vector<1x8x8xf32> to vector<1xf32>
      %26 = vector.shape_cast %25 : vector<1xf32> to vector<1x1x1xf32>
      %27 = vector.extract %26[0, 0, 0] : f32 from vector<1x1x1xf32>
      %cst_17 = arith.constant 0.000000e+00 : f32
      %28 = vector.broadcast %cst_17 : f32 to vector<1x8x128xf32>
      %29 = vector.broadcast %22 : f32 to vector<1x8x128xf32>
      %30 = arith.addf %28, %29 : vector<1x8x128xf32>
      %c0_18 = arith.constant 0 : index
      %c0_19 = arith.constant 0 : index
      %c0_20 = arith.constant 0 : index
      %31 = vector.load %arg4[%c0_18, %c0_19, %c0_20] : memref<1x8x128xf32, #tpu.memory_space<vmem>>, vector<1x8x128xf32>
      tpu.vector_store %arg4[%c0_18, %c0_19, %c0_20], %30 {strides = array<i32>} : memref<1x8x128xf32, #tpu.memory_space<vmem>>, vector<1x8x128xf32>,
      %cst_21 = arith.constant 0.000000e+00 : f32
      %32 = vector.broadcast %cst_21 : f32 to vector<1x8x128xf32>
      %33 = vector.broadcast %27 : f32 to vector<1x8x128xf32>
      %34 = arith.addf %32, %33 : vector<1x8x128xf32>
      %c0_22 = arith.constant 0 : index
      %c0_23 = arith.constant 0 : index
      %c0_24 = arith.constant 0 : index
      %35 = vector.load %arg5[%c0_22, %c0_23, %c0_24] : memref<1x8x128xf32, #tpu.memory_space<vmem>>, vector<1x8x128xf32>
      tpu.vector_store %arg5[%c0_22, %c0_23, %c0_24], %34 {strides = array<i32>} : memref<1x8x128xf32, #tpu.memory_space<vmem>>, vector<1x8x128xf32>,
    } else {
    }
    return
  }
  func.func @transform_0(%arg0: i32, %arg1: i32) -> (i32, i32, i32) {
    %c0_i32 = arith.constant 0 : i32
    %c0_i32_0 = arith.constant 0 : i32
    return %arg0, %c0_i32, %arg1 : i32, i32, i32
  }
  func.func @transform_1(%arg0: i32, %arg1: i32) -> (i32, i32, i32) {
    %c0_i32 = arith.constant 0 : i32
    %c0_i32_0 = arith.constant 0 : i32
    %c0_i32_1 = arith.constant 0 : i32
    return %arg0, %c0_i32, %c0_i32_0 : i32, i32, i32
  }
  func.func @transform_2(%arg0: i32, %arg1: i32) -> (i32, i32, i32) {
    %c0_i32 = arith.constant 0 : i32
    %c0_i32_0 = arith.constant 0 : i32
    %c0_i32_1 = arith.constant 0 : i32
    return %arg0, %c0_i32, %c0_i32_0 : i32, i32, i32
  }
  func.func @transform_3(%arg0: i32, %arg1: i32) -> (i32, i32, i32) {
    %c0_i32 = arith.constant 0 : i32
    %c0_i32_0 = arith.constant 0 : i32
    %c0_i32_1 = arith.constant 0 : i32
    return %arg0, %c0_i32, %c0_i32_0 : i32, i32, i32
  }
}

</mosaic_0001>

<bundles_post_ra>
// kernel: tpu_custom_call.1
= control target key start
LH: loop header
LB: loop body
LE: loop exit
PB: predicated region body
PF: predicated region fallthrough
CT: control target
= control target key end

     0   :  { %9 = vsyncpa [#allocation4], 0  ;;  %s975_s0 = inlined_call_operand.hbm [shape: f32[2,8,256], index: 0, kind: input, shape index: {}]   ;;  %s976_s1 = inlined_call_operand.hbm [shape: f32[2,8,8], index: 1, kind: input, shape index: {}]   ;;  %s977_s2 = inlined_call_operand.hbm [shape: f32[2,8,128], index: 2, kind: output, shape index: {0}]   ;;  %s978_s3 = inlined_call_operand.hbm [shape: f32[2,8,128], index: 3, kind: output, shape index: {1}]  }
   0x1   :  { %11 = vsyncpa [#allocation4 + $0x1], 0 }
   0x2   :  { %12 = vsyncpa [#allocation7], 0 }
   0x3   :  { %14 = vsyncpa [#allocation7 + $0x1], 0 }
   0x4   :  { %15 = vsyncpa [#allocation5], 0 }
   0x5   :  { %17 = vsyncpa [#allocation5 + $0x1], 0 }
   0x6   :  { %18 = vsyncpa [#allocation10], 0 }
   0x7   :  { %20 = vsyncpa [#allocation10 + $0x1], 0  ;;  %s814_s12 = smov 0   ;;  %s816_s13 = smov 0  }
   0x8   :  { %s818_s14 = smov 0   ;;  %s820_s15 = smov 0  }
   0x9   :  { %s822_s16 = smov 0   ;;  %s824_s17 = smov 0  }
   0xa LB: > { %s515_s18 = sadd.s32 4294967295, %s791_s17   ;;  %s516_s19 = sadd.s32 4294967294, %s791_s17   ;;  %s791_s17 = sphi %s824_s17, %s26_s17   ;;  %s787_s16 = sphi %s822_s16, %s988_s16   ;;  %s783_s15 = sphi %s820_s15, %s987_s15   ;;  %s779_s14 = sphi %s818_s14, %s986_s14   ;;  %s775_s13 = sphi %s816_s13, %s985_s13   ;;  %s771_s12 = sphi %s814_s12, %s984_s12  }
   0xb   : > { %s38_s20 = sadd.s32 1, %s787_s16  ;;  %s47_s21 = sadd.s32 1, %s779_s14 }
   0xc   : > { %p40_p0 = scmp.ge.s32.totalorder %s38_s20, 2  ;;  %p54_p1 = scmp.ne.s32.totalorder %s779_s14, %s775_s13 }
   0xd   : > { %p55_p2 = scmp.eq.s32.totalorder %s791_s17, 0  ;;  %p60_p3 = scmp.ne.s32.totalorder %s775_s13, %s771_s12 }
   0xe   : > { %s990_s20 = smov (%p40_p0, %s38_s20), 0  ;;  %p61_p5 = scmp.eq.s32.totalorder %s515_s18, 0 }
   0xf   : > { %p855_p4 = por %p55_p2, %p54_p1  ;;  %s42_s23 = ssub.s32 %s787_s16, %s990_s20 }
  0x10   : > { %p110_p6 = scmp.eq.s32.totalorder %s515_s18, 1  ;;  %p45_p7 = scmp.eq.s32.totalorder %s42_s23, 0 }
  0x11   : > { %p861_p8 = por %p61_p5, %p60_p3  ;;  %p116_p10 = scmp.eq.s32.totalorder %s516_s19, 1 }
  0x12   : > { %p865_p9 = por %p110_p6, %p54_p1  ;;  %p518_p12 = scmp.ge.s32.totalorder %s791_s17, 2 }
  0x13   : > { %s870_s26 = scalar_select %p45_p7, %s779_s14, %s47_s21  }
  0x14   : > { %p872_p11 = por %p116_p10, %p60_p3  ;;  %p562_p13 = scmp.lt.s32.totalorder %s791_s17, 2 }
  0x15   : > { %s162_s28 = sand.u32 1, %s779_s14   ;;  %s535_s30 = sshll.u32 %s787_s16, 4 }
  0x16   : > { %s519_s29 = sshll.u32 %s162_s28, 4  ;;  %s173_s6 = scalar_lea.hbm %s975_s0, %s535_s30 }
  0x17   : > { %s166_s7 = scalar_lea.vmem [#allocation3], %s519_s29  ;;  %s175_s9 = sshll.u32 %s173_s6, 4  ;;  %s176_s9 = int_to_ptr.hbm [resolvable:$true] %s175_s9 }
  0x18   : > { %s177_s8 = sshll.u32 %s166_s7, 4  ;;  %p885_p0 = pnand %p562_p13, %p855_p4  ;;  %s178_s8 = int_to_ptr.vmem [resolvable:$true] %s177_s8 }
  0x19   : > { %p524_p1 = scmp.ge.s32.totalorder %s791_s17, 1  ;;  %p201_p2 = scmp.lt.s32.totalorder %s791_s17, 3 }
  0x1a   : > { %s163_s11 = scalar_lea.sflag [#allocation4], %s162_s28  ;;  %s522_s18 = sshll.u32 %s162_s28, 3 }
  0x1b   : > { %551 = dma.hbm_to_vmem [thread:$0]  (!%p885_p0), %s176_s9, 256, %s178_s8, %s163_s11  }
  0x1c   : > { %p202_p3 = pnand %p524_p1, %p201_p2  ;;  %s523_s19 = sshll.u32 %s787_s16, 3 }
  0x1d   : > { %s192_s29 = scalar_lea.hbm %s976_s1, %s523_s19  ;;  %s188_s30 = scalar_lea.vmem [#allocation6], %s522_s18 }
  0x1e   : > { %s196_s22 = sshll.u32 %s188_s30, 4  ;;  %s194_s4 = sshll.u32 %s192_s29, 4  ;;  %s197_s22 = int_to_ptr.vmem [resolvable:$true] %s196_s22  ;;  %s195_s4 = int_to_ptr.hbm [resolvable:$true] %s194_s4 }
  0x1f   : > { %s185_s5 = scalar_lea.sflag [#allocation7], %s162_s28  ;;  %205 = sbr.rel (%p202_p3) target bundleno = 385 (0x181), region = 28 }
  0x20   : > { %554 = dma.hbm_to_vmem [thread:$0]  (!%p885_p0), %s195_s4, 128, %s197_s22, %s185_s5  }
  0x21   : > { %s900_s6 = sand.u32 (!%p202_p3), 1, %s775_s13  }
  0x22   : > { %s525_s7 = sshll.u32 (!%p202_p3), %s900_s6, 4  ;;  %s208_s8 = scalar_lea.sflag (!%p202_p3), [#allocation4], %s900_s6 }
  0x23   : > { %s211_s9 = scalar_lea.vmem (!%p202_p3), [#allocation3], %s525_s7 }
  0x24   : > { %754 = dma.done.wait (%p861_p8), %s208_s8, 256  }
  0x25   : > { %756 = vsyncadd (%p861_p8), %s208_s8, 4294967040  ;;  %s909_s28 = sshll.u32 %s900_s6, 3  ;;  %s218_s10 = scalar_lea.sflag [#allocation7], %s900_s6 }
  0x26   : > { %s221_s11 = scalar_lea.vmem [#allocation6], %s909_s28 }
  0x27   : > { %758 = dma.done.wait (%p861_p8), %s218_s10, 128  }
  0x28   : > { %760 = vsyncadd (%p861_p8), %s218_s10, 4294967168  ;;  %v262_v0 = vld [vmem:[%s211_s9] sm:$0xff]  ;;  %v263_v1 = vld [vmem:[%s211_s9 + $0x8] sm:$0xff]  ;;  %vm260_vm0 = vcmask 64512   ;;  %v793_v2 = vmov 0.0   ;;  %s531_s24 = sshll.u32 %s783_s15, 3 }
  0x29   : > { %280 = vmatpush.xpose.msra.mxu0 %v262_v0  ;;  %300 = vmatpush.xpose.msra.mxu1 %v263_v1  ;;  %261 = vst.msk [vmem:[#allocation2] sm:$0xff] %vm260_vm0, %v793_v2  ;;  %v313_v9 = vld [vmem:[%s221_s11] sm:$0xff]  ;;  %s359_s21 = scalar_lea.hbm %s977_s2, %s531_s24  ;;  %s247_s23 = scalar_lea.vmem [#allocation8], %s909_s28 }
  0x2a   : > { %s361_s29 = sshll.u32 %s247_s23, 4  ;;  %s363_s30 = sshll.u32 %s359_s21, 4  ;;  %s362_s29 = int_to_ptr.vmem [resolvable:$true] %s361_s29  ;;  %s364_s30 = int_to_ptr.hbm [resolvable:$true] %s363_s30 }
  0x2b   : > { %s373_s7 = scalar_lea.hbm %s978_s3, %s531_s24  ;;  %s344_s8 = scalar_lea.sflag [#allocation5], %s900_s6 }
  0x2c   : > { %281 = vmatmul.f32.vlgmr.msra.gmra.mxu0 %v262_v0  ;;  %301 = vmatmul.f32.vlgmr.msra.gmra.mxu1 %v263_v1  ;;  %s687_s9 = sshra.s32 %s364_s30, 4  ;;  %s693_s18 = scalar_lea.hbm %s977_s2, 16  ;;  %s688_s9 = int_to_ptr.hbm [resolvable:$true] %s687_s9 }
  0x2d   : > { %s689_s15 = scalar_lea.hbm %s688_s9, 8  ;;  %p694_p7 = scmp.lt.s32.totalorder %s688_s9, %s977_s2 }
  0x2e   : > { %p690_p4 = scmp.ne.s32.totalorder %s688_s9, %s689_s15  ;;  %p695_p8 = scmp.lt.s32.totalorder %s693_s18, %s689_s15 }
  0x30   : > { %v264_v4 = vld [vmem:[#allocation2] sm:$0xff]  ;;  %p691_p5 = pnand %p690_p4, %p865_p9  ;;  %p696_p10 = por %p695_p8, %p694_p7 }
  0x32   : > { %p692_p6 = pneg %p691_p5 }
  0x34   : > { %p697_p13 = pnand %p696_p10, %p692_p6 }
  0xa9   : > { %v282_v3 = vpop.f32.mrf.mxu0  ;;  %v302_v5 = vpop.f32.mrf.mxu1 }
  0xaa   : > { %v303_v6 = vadd.f32 %v302_v5, %v282_v3 }
  0xac   : > { %v305_v7 = vadd.f32 %v303_v6, %v264_v4 }
  0xae   : > { %307 = vst.msk [vmem:[#allocation2] sm:$0xff] %vm260_vm0, %v305_v7 }
  0xb5   : > { %v311_v8 = vld [vmem:[#allocation2] sm:$0xff] }
  0xb6   : > { %v312_v10 = vmul.f32 0.00390625, %v311_v8 }
  0xb8   : > { %v314_v11 = vsub.f32 %v312_v10, %v313_v9 }
  0xba   : > { %v315_v12 = vmul.f32 %v314_v11, %v314_v11  ;;  %v326_v14 = vand.u32 2147483647, %v314_v11 }
  0xbc   : > { %v316_v13 = vsel %vm260_vm0, %v315_v12, 0.0  ;;  %v327_v15 = vsel %vm260_vm0, %v326_v14, 0.0 }
  0xbd   : > { %317 = vadd.xlane.f32.xlu0 %v316_v13 }
  0xc5   : > { %328 = vadd.xlane.f32.xlu0 %v327_v15 }
 0x130   : > { %v318_v16 = vpop.xlane.xlu0 %317 }
 0x131   : > { %v319_v17 = vrot.slane %v318_v16, 4 }
 0x133   : > { %v320_v18 = vadd.f32 %v319_v17, %v318_v16 }
 0x135   : > { %v321_v19 = vrot.slane %v320_v18, 2 }
 0x137   : > { %v322_v20 = vadd.f32 %v321_v19, %v320_v18 }
 0x138   : > { %v329_v21 = vpop.xlane.xlu0 %328 }
 0x139   : > { %v330_v22 = vrot.slane %v329_v21, 4  ;;  %v323_v23 = vrot.slane %v322_v20, 1 }
 0x13b   : > { %v331_v24 = vadd.f32 %v330_v22, %v329_v21  ;;  %v324_v25 = vadd.f32 %v323_v23, %v322_v20 }
 0x13d   : > { %v332_v26 = vrot.slane %v331_v24, 2  ;;  %536 = vpush %v324_v25 }
 0x13f   : > { %v333_v27 = vadd.f32 %v332_v26, %v331_v24 }
 0x141   : > { %v334_v28 = vrot.slane %v333_v27, 1 }
 0x143   : > { %v335_v29 = vadd.f32 %v334_v28, %v333_v27 }
 0x145   : > { %538 = vpush %v335_v29 }
 0x16e   : > { %s537_s22 = spop %536 }
 0x16f   : > { %v337_v30 = vstv %s537_s22 }
 0x170   : > { %339 = vst [vmem:[%s247_s23] sm:$0xff] %v337_v30 }
 0x171   : > { %700 = shalt.err (!%p697_p13)
}
 0x172   : > { %544 = dma.vmem_to_hbm [thread:$0]  (%p865_p9), %s362_s29, 128, %s364_s30, %s344_s8  }
 0x173   : > { %s254_s24 = scalar_lea.vmem [#allocation9], %s909_s28  ;;  %s377_s22 = sshll.u32 %s373_s7, 4  ;;  %s378_s22 = int_to_ptr.hbm [resolvable:$true] %s377_s22 }
 0x174   : > { %s375_s23 = sshll.u32 %s254_s24, 4  ;;  %s349_s5 = scalar_lea.sflag [#allocation10], %s900_s6  ;;  %s376_s23 = int_to_ptr.vmem [resolvable:$true] %s375_s23 }
 0x175   : > { %s715_s9 = sshra.s32 %s378_s22, 4  ;;  %s721_s29 = scalar_lea.hbm %s978_s3, 16  ;;  %s716_s9 = int_to_ptr.hbm [resolvable:$true] %s715_s9 }
 0x176   : > { %s539_s4 = spop %538  ;;  %s717_s15 = scalar_lea.hbm %s716_s9, 8 }
 0x177   : > { %v340_v31 = vstv %s539_s4  ;;  %p718_p0 = scmp.ne.s32.totalorder %s716_s9, %s717_s15  ;;  %p722_p3 = scmp.lt.s32.totalorder %s716_s9, %s978_s3 }
 0x178   : > { %342 = vst [vmem:[%s254_s24] sm:$0xff] %v340_v31  ;;  %p723_p4 = scmp.lt.s32.totalorder %s721_s29, %s717_s15 }
 0x179   : > { %p719_p1 = pnand %p718_p0, %p865_p9 }
 0x17a   : > { %p724_p5 = por %p723_p4, %p722_p3 }
 0x17b   : > { %p720_p2 = pneg %p719_p1 }
 0x17d   : > { %p725_p6 = pnand %p724_p5, %p720_p2 }
 0x17f   : > { %728 = shalt.err (!%p725_p6)
}
 0x180   : > { %545 = dma.vmem_to_hbm [thread:$0]  (%p865_p9), %s376_s23, 128, %s378_s22, %s349_s5  }
 0x181 PF: > { %s389_s6 = sand.u32 1, %s771_s12   ;;  %p556_p7 = pnand %p518_p12, %p872_p11 }
 0x182   : > { %s390_s7 = scalar_lea.sflag [#allocation5], %s389_s6 }
 0x183   : > { %p557_p8 = pneg %p556_p7 }
 0x185   : > { %762 = dma.done.wait (%p557_p8), %s390_s7, 128  }
 0x186   : > { %764 = vsyncadd (%p557_p8), %s390_s7, 4294967168  ;;  %s400_s8 = scalar_lea.sflag [#allocation10], %s389_s6 }
 0x187   : > { %766 = dma.done.wait (%p557_p8), %s400_s8, 128  }
 0x188   : > { %768 = vsyncadd (%p557_p8), %s400_s8, 4294967168  ;;  %s26_s17 = sadd.s32 1, %s791_s17   ;;  %s984_s12 = smov %s775_s13 }
 0x189   : > { %p23_p10 = scmp.ge.s32.totalorder %s26_s17, 4   ;;  %s985_s13 = smov %s779_s14 }
 0x18a   : > { %s986_s14 = smov %s870_s26  ;;  %s987_s15 = smov %s787_s16 }
 0x18b   : > { %s988_s16 = smov %s990_s20  ;;  %25 = sbr.rel (!%p23_p10) target bundleno = 10 (0xa), region = 111 }
 0x190   :  { %406 = vsyncpa [#allocation4], 1 }
 0x191   :  { %408 = vsyncpa [#allocation4 + $0x1], 1 }
 0x192   :  { %409 = vsyncpa [#allocation7], 1 }
 0x193   :  { %411 = vsyncpa [#allocation7 + $0x1], 1 }
 0x194   :  { %412 = vsyncpa [#allocation5], 1 }
 0x195   :  { %414 = vsyncpa [#allocation5 + $0x1], 1 }
 0x196   :  { %415 = vsyncpa [#allocation10], 1 }
 0x197   :  { %417 = vsyncpa [#allocation10 + $0x1], 1 }

</bundles_post_ra>
